<compile_context>
chip_gen: v6e
topology: v6e:2x2x1
jax: 0.10.0
libtpu: 0.0.40
codegen_flags: <defaults>
</compile_context>

<pallas_src>
import math

import jax
import jax.numpy as jnp
from jax import lax
from jax.experimental import pallas as pl
from jax.experimental.pallas import tpu as pltpu


def _pick_block(n, candidates):
    """Largest candidate that divides n, else n itself (block == full dim)."""
    for c in candidates:
        if n % c == 0:
            return c
    return n


# --------------------------------------------------------------------------
# Preprocess pass 1: ReLU -> 1x1 conv (channel matmul) + per-block BN partials
# --------------------------------------------------------------------------
def _conv_stats_kernel(x_ref, w_ref, y_ref, ps_ref):
    # ReLU in the input dtype, matmul accumulates in f32 on the MXU.
    x = jnp.maximum(x_ref[...], 0).astype(w_ref.dtype)
    y = jnp.dot(x, w_ref[...], preferred_element_type=jnp.float32)
    y_ref[...] = y
    # Per-block partial sums for the (two-pass) batch-norm statistics.
    ps_ref[:, 0:1, :] = jnp.sum(y, axis=0, keepdims=True)[None]
    ps_ref[:, 1:2, :] = jnp.sum(y * y, axis=0, keepdims=True)[None]


# --------------------------------------------------------------------------
# Preprocess pass 2: y_hat = y * scale + shift   (scale/shift fold BN affine)
# --------------------------------------------------------------------------
def _bn_apply_kernel(y_ref, sc_ref, sh_ref, o_ref):
    o_ref[...] = (y_ref[...] * sc_ref[...] + sh_ref[...]).astype(o_ref.dtype)


def preprocess_relu_conv_bn(x2d, w, gamma, beta, out_dtype, eps=1e-5):
    P, C_in = x2d.shape
    C_out = w.shape[1]
    TP = _pick_block(P, (2048, 1024, 512, 256, 128, 64, 32, 16, 8))
    nP = P // TP
    cparams = pltpu.CompilerParams(dimension_semantics=("parallel",),
                                   vmem_limit_bytes=32 * 1024 * 1024)

    # Pass 1: conv + partial stats (streamed over P blocks, megacore-parallel).
    y2d, psum = pl.pallas_call(
        _conv_stats_kernel,
        out_shape=(jax.ShapeDtypeStruct((P, C_out), jnp.float32),
                   jax.ShapeDtypeStruct((nP, 2, C_out), jnp.float32)),
        grid_spec=pltpu.PrefetchScalarGridSpec(
            num_scalar_prefetch=0,
            grid=(nP,),
            in_specs=[pl.BlockSpec((TP, C_in), lambda p: (p, 0)),
                      pl.BlockSpec((C_in, C_out), lambda p: (0, 0))],
            out_specs=[pl.BlockSpec((TP, C_out), lambda p: (p, 0)),
                       pl.BlockSpec((1, 2, C_out), lambda p: (p, 0, 0))],
        ),
        compiler_params=cparams,
    )(x2d, w)

    # Tiny host-graph reduction of the partials; BN stats stay in f32.
    stats = jnp.sum(psum, axis=0)                       # (2, C_out)
    mean = stats[0] / P
    var = stats[1] / P - mean * mean                    # biased (training) var
    scale = (gamma.reshape(1, C_out) * lax.rsqrt(var + eps)).astype(jnp.float32)
    shift = (beta.reshape(1, C_out) - mean.reshape(1, C_out) * scale)

    # Pass 2: normalize (streamed over P blocks, megacore-parallel).
    return pl.pallas_call(
        _bn_apply_kernel,
        out_shape=jax.ShapeDtypeStruct((P, C_out), out_dtype),
        grid_spec=pltpu.PrefetchScalarGridSpec(
            num_scalar_prefetch=0,
            grid=(nP,),
            in_specs=[pl.BlockSpec((TP, C_out), lambda p: (p, 0)),
                      pl.BlockSpec((1, C_out), lambda p: (0, 0)),
                      pl.BlockSpec((1, C_out), lambda p: (0, 0))],
            out_specs=pl.BlockSpec((TP, C_out), lambda p: (p, 0)),
        ),
        compiler_params=cparams,
    )(y2d, scale, shift)


# --------------------------------------------------------------------------
# 3x3 pooling kernel (stride s, padding 1) on lane-dense layout (H, W, SB, 128)
# --------------------------------------------------------------------------
def _make_pool_kernel(mode, H, W, SB, L, H_out, W_out, s):
    Hp = H_out * s + 2          # >= H + 2, covers all (possibly strided) taps
    Wp = W_out * s + 2
    is_max = (mode == "max")
    pad_val = float("-inf") if is_max else 0.0
    red = jnp.maximum if is_max else jnp.add
    f32 = jnp.float32

    def kernel(x_ref, o_ref, pad_ref, row_ref):
        # ---- halo-only init of the padded scratch (interior is overwritten) --
        pad_ref[0:1, :, :, :] = jnp.full((1, Wp, SB, L), pad_val, f32)
        pad_ref[H + 1:Hp, :, :, :] = jnp.full((Hp - H - 1, Wp, SB, L), pad_val, f32)
        pad_ref[1:H + 1, 0:1, :, :] = jnp.full((H, 1, SB, L), pad_val, f32)
        pad_ref[1:H + 1, W + 1:Wp, :, :] = jnp.full((H, Wp - W - 1, SB, L), pad_val, f32)
        pad_ref[1:H + 1, 1:W + 1, :, :] = x_ref[...].astype(f32)

        # ---- separable 3x3: reduce over dy (rows), then over dx (cols) ------
        # Stride subsampling uses leading-dim reshape + static index 0, so the
        # (SB, 128) tile is never sliced.
        def row_tap(dy):
            r = pad_ref[dy:dy + H_out * s, :, :, :]          # (H_out*s, Wp, SB, L)
            return r.reshape(H_out, s, Wp, SB, L)[:, 0]

        rr = row_tap(0)
        rr = red(rr, row_tap(1))
        rr = red(rr, row_tap(2))
        row_ref[...] = rr                                    # (H_out, Wp, SB, L)

        def col_tap(dx):
            c = row_ref[:, dx:dx + W_out * s, :, :]          # (H_out, W_out*s, SB, L)
            return c.reshape(H_out, W_out, s, SB, L)[:, :, 0]

        acc = col_tap(0)
        acc = red(acc, col_tap(1))
        acc = red(acc, col_tap(2))

        if is_max:
            o_ref[...] = acc.astype(o_ref.dtype)
        else:
            # count_include_pad=False: interior windows have 9 valid taps;
            # clipped border rows/cols have 2 (not 3) valid taps along that
            # axis.  Divide by 9 and rescale the (compile-time known) clipped
            # borders by 3/2 — corners compose to the correct 1/4, 1/6 factors.
            o_ref[...] = (acc * (1.0 / 9.0)).astype(o_ref.dtype)
            o_ref[0:1, :, :, :] = o_ref[0:1, :, :, :] * 1.5           # top row
            if (H_out - 1) * s + 1 >= H:                              # bottom row
                o_ref[H_out - 1:H_out, :, :, :] = o_ref[H_out - 1:H_out, :, :, :] * 1.5
            o_ref[:, 0:1, :, :] = o_ref[:, 0:1, :, :] * 1.5           # left col
            if (W_out - 1) * s + 1 >= W:                              # right col
                o_ref[:, W_out - 1:W_out, :, :] = o_ref[:, W_out - 1:W_out, :, :] * 1.5

    return kernel, Hp, Wp


def pool3x3(x_hwsl, stride, mode):
    H, W, S, L = x_hwsl.shape                       # L == 128 (lane-dense)
    H_out = (H + 2 - 3) // stride + 1
    W_out = (W + 2 - 3) // stride + 1
    # Grid over the folded N*C dim: "parallel" (megacore) + bounded VMEM.
    # TODO(synk): very large H*W would additionally need H-tiling with a halo.
    SB = _pick_block(S, (8,))
    kernel, Hp, Wp = _make_pool_kernel(mode, H, W, SB, L, H_out, W_out, stride)

    return pl.pallas_call(
        kernel,
        out_shape=jax.ShapeDtypeStruct((H_out, W_out, S, L), x_hwsl.dtype),
        grid_spec=pltpu.PrefetchScalarGridSpec(
            num_scalar_prefetch=0,
            grid=(S // SB,),
            in_specs=[pl.BlockSpec((H, W, SB, L), lambda b: (0, 0, b, 0))],
            out_specs=pl.BlockSpec((H_out, W_out, SB, L), lambda b: (0, 0, b, 0)),
            scratch_shapes=[pltpu.VMEM((Hp, Wp, SB, L), jnp.float32),
                            pltpu.VMEM((H_out, Wp, SB, L), jnp.float32)],
        ),
        compiler_params=pltpu.CompilerParams(
            dimension_semantics=("parallel",),
            vmem_limit_bytes=32 * 1024 * 1024,
        ),
    )(x_hwsl)


# --------------------------------------------------------------------------
# POOLING.forward
# --------------------------------------------------------------------------
def pooling_forward(x_nchw, stride, mode, C_out, params=None):
    N, C_in, H, W = x_nchw.shape
    dtype = x_nchw.dtype

    if C_in != C_out:                                          # ReLUConvBN
        x_nhwc = jnp.transpose(x_nchw, (0, 2, 3, 1))
        y2d = preprocess_relu_conv_bn(
            x_nhwc.reshape(N * H * W, C_in),
            params["w"], params["gamma"], params["beta"], out_dtype=dtype)
        x_hwnc = jnp.transpose(y2d.reshape(N, H, W, C_out), (1, 2, 0, 3))
        C = C_out
    else:
        # single layout change straight to the pooling layout
        x_hwnc = jnp.transpose(x_nchw, (2, 3, 0, 1))           # (H, W, N, C)
        C = C_in

    # Fold (N, C) into a lane-dense trailing dim padded to a multiple of 128.
    F = N * C
    F_pad = ((F + 127) // 128) * 128
    xf = x_hwnc.reshape(H, W, F)
    if F_pad != F:
        xf = jnp.pad(xf, ((0, 0), (0, 0), (0, F_pad - F)))
    S = F_pad // 128

    out = pool3x3(xf.reshape(H, W, S, 128), stride, mode)      # (Ho, Wo, S, 128)
    H_out, W_out = out.shape[0], out.shape[1]
    out = out.reshape(H_out, W_out, F_pad)[:, :, :F].reshape(H_out, W_out, N, C)
    return jnp.transpose(out, (2, 3, 0, 1))                    # NCHW


# --------------------------------------------------------------------------
# Pure-JAX reference (for self-check)
# --------------------------------------------------------------------------
def _ref_forward(x_nchw, stride, mode, C_out, params=None):
    N, C_in, H, W = x_nchw.shape
    x = jnp.transpose(x_nchw, (0, 2, 3, 1)).astype(jnp.float32)
    if C_in != C_out:
        y = jnp.maximum(x, 0.0).reshape(-1, C_in) @ params["w"]
        mean = y.mean(0, keepdims=True)
        var = ((y - mean) ** 2).mean(0, keepdims=True)
        y = (y - mean) / jnp.sqrt(var + 1e-5) * params["gamma"] + params["beta"]
        x = y.reshape(N, H, W, C_out)
    pad = ((0, 0), (1, 1), (1, 1), (0, 0))
    win, strd = (1, 3, 3, 1), (1, stride, stride, 1)
    if mode == "max":
        out = lax.reduce_window(x, -jnp.inf, lax.max, win, strd, pad)
    else:
        s_ = lax.reduce_window(x, 0.0, lax.add, win, strd, pad)
        c_ = lax.reduce_window(jnp.ones_like(x), 0.0, lax.add, win, strd, pad)
        out = s_ / c_
    return jnp.transpose(out, (0, 3, 1, 2))


if __name__ == "__main__":
    key = jax.random.PRNGKey(0)
    kx, kw = jax.random.split(key)

    N, C_in, H, W = 2, 4, 16, 16
    C_out = 8
    x = jax.random.normal(kx, (N, C_in, H, W), dtype=jnp.float32)

    # deterministic preprocess params: 1x1 conv weight (C_in, C_out), BN affine
    params = {
        "w": jax.random.normal(kw, (C_in, C_out), dtype=jnp.float32)
              * (1.0 / math.sqrt(C_in)),
        "gamma": jnp.ones((1, C_out), jnp.float32),
        "beta": jnp.zeros((1, C_out), jnp.float32),
    }

    configs = [
        (2, "avg", C_out, params),   # C_in != C_out -> ReLU-Conv1x1-BN preprocess
        (2, "max", C_out, params),
        (1, "max", C_in, None),      # C_in == C_out -> no preprocess
        (1, "avg", C_in, None),
    ]
    for stride, mode, co, p in configs:
        out = pooling_forward(x, stride, mode, co, p)
        jax.block_until_ready(out)
        ref = _ref_forward(x, stride, mode, co, p)
        assert out.shape == ref.shape, (out.shape, ref.shape)
        assert jnp.allclose(out, ref, atol=2e-3, rtol=2e-3), (stride, mode, co)

    print("KERNEL_OK")
</pallas_src>

<mosaic_0001>
module attributes {stable_mosaic.version = 11 : i64} {
  func.func @_conv_stats_kernel(%arg0: i32, %arg1: memref<512x4xf32, #tpu.memory_space<vmem>>, %arg2: memref<4x8xf32, #tpu.memory_space<vmem>>, %arg3: memref<512x8xf32, #tpu.memory_space<vmem>>, %arg4: memref<1x2x8xf32, #tpu.memory_space<vmem>>) attributes {dimension_semantics = [#tpu.dimension_semantics<parallel>], iteration_bounds = array<i64: 1>, scalar_prefetch = 0 : i64, scratch_operands = 0 : i64, tpu.core_type = #tpu.core_type<tc>, window_params = [{transform_indices = @transform_0, window_bounds = array<i64: 512, 4>}, {pipeline_mode = #tpu.pipeline_mode<synchronous>, transform_indices = @transform_1, window_bounds = array<i64: 4, 8>}, {transform_indices = @transform_2, window_bounds = array<i64: 512, 8>}, {transform_indices = @transform_3, window_bounds = array<i64: 1, 2, 8>}]} {
    %c0 = arith.constant 0 : index
    %c0_0 = arith.constant 0 : index
    %0 = vector.load %arg1[%c0, %c0_0] : memref<512x4xf32, #tpu.memory_space<vmem>>, vector<512x4xf32>
    %cst = arith.constant 0.000000e+00 : f32
    %1 = vector.broadcast %cst : f32 to vector<512x4xf32>
    %2 = arith.maximumf %0, %1 : vector<512x4xf32>
    %c0_1 = arith.constant 0 : index
    %c0_2 = arith.constant 0 : index
    %3 = vector.load %arg2[%c0_1, %c0_2] : memref<4x8xf32, #tpu.memory_space<vmem>>, vector<4x8xf32>
    %cst_3 = arith.constant dense<0.000000e+00> : vector<512x8xf32>
    %4 = tpu.matmul %2, %3, %cst_3 {dimension_numbers = #tpu.dot_dimension_numbers<[1], [0], [0], [1], [0, 0, 1, 1], [], []>} : vector<512x4xf32>, vector<4x8xf32>, vector<512x8xf32> -> vector<512x8xf32>
    %c0_4 = arith.constant 0 : index
    %c0_5 = arith.constant 0 : index
    %5 = vector.load %arg3[%c0_4, %c0_5] : memref<512x8xf32, #tpu.memory_space<vmem>>, vector<512x8xf32>
    tpu.vector_store %arg3[%c0_4, %c0_5], %4 {strides = array<i32>} : memref<512x8xf32, #tpu.memory_space<vmem>>, vector<512x8xf32>,
    %cst_6 = arith.constant dense<0.000000e+00> : vector<8xf32>
    %6 = vector.multi_reduction <add>, %4, %cst_6 [0] : vector<512x8xf32> to vector<8xf32>
    %7 = vector.shape_cast %6 : vector<8xf32> to vector<1x8xf32>
    %8 = vector.shape_cast %7 : vector<1x8xf32> to vector<1x1x8xf32>
    %c0_7 = arith.constant 0 : index
    %c0_8 = arith.constant 0 : index
    %c0_9 = arith.constant 0 : index
    %9 = vector.load %arg4[%c0_7, %c0_8, %c0_9] : memref<1x2x8xf32, #tpu.memory_space<vmem>>, vector<1x1x8xf32>
    tpu.vector_store %arg4[%c0_7, %c0_8, %c0_9], %8 {strides = array<i32>} : memref<1x2x8xf32, #tpu.memory_space<vmem>>, vector<1x1x8xf32>,
    %10 = arith.mulf %4, %4 : vector<512x8xf32>
    %cst_10 = arith.constant dense<0.000000e+00> : vector<8xf32>
    %11 = vector.multi_reduction <add>, %10, %cst_10 [0] : vector<512x8xf32> to vector<8xf32>
    %12 = vector.shape_cast %11 : vector<8xf32> to vector<1x8xf32>
    %13 = vector.shape_cast %12 : vector<1x8xf32> to vector<1x1x8xf32>
    %c0_11 = arith.constant 0 : index
    %c1 = arith.constant 1 : index
    %c0_12 = arith.constant 0 : index
    %14 = vector.load %arg4[%c0_11, %c1, %c0_12] : memref<1x2x8xf32, #tpu.memory_space<vmem>>, vector<1x1x8xf32>
    tpu.vector_store %arg4[%c0_11, %c1, %c0_12], %13 {strides = array<i32>} : memref<1x2x8xf32, #tpu.memory_space<vmem>>, vector<1x1x8xf32>,
    return
  }
  func.func @transform_0(%arg0: i32) -> (i32, i32) {
    %c0_i32 = arith.constant 0 : i32
    %c0_i32_0 = arith.constant 0 : i32
    return %arg0, %c0_i32 : i32, i32
  }
  func.func @transform_1(%arg0: i32) -> (i32, i32) {
    %c0_i32 = arith.constant 0 : i32
    %c0_i32_0 = arith.constant 0 : i32
    %c0_i32_1 = arith.constant 0 : i32
    return %c0_i32, %c0_i32_0 : i32, i32
  }
  func.func @transform_2(%arg0: i32) -> (i32, i32) {
    %c0_i32 = arith.constant 0 : i32
    %c0_i32_0 = arith.constant 0 : i32
    return %arg0, %c0_i32 : i32, i32
  }
  func.func @transform_3(%arg0: i32) -> (i32, i32, i32) {
    %c0_i32 = arith.constant 0 : i32
    %c0_i32_0 = arith.constant 0 : i32
    %c0_i32_1 = arith.constant 0 : i32
    return %arg0, %c0_i32, %c0_i32_0 : i32, i32, i32
  }
}

</mosaic_0001>

<bundles_post_ra>
// kernel: tpu_custom_call.1
= control target key start
LH: loop header
LB: loop body
LE: loop exit
PB: predicated region body
PF: predicated region fallthrough
CT: control target
= control target key end

     0   :  { %vm336_vm0 = vcmask 1043456   ;;  %vm143_vm1 = vcmask 31744   ;;  %s2253_s0 = inlined_call_operand.vmem [shape: f32[512,4], index: 0, kind: input, shape index: {}]   ;;  %s2254_s1 = inlined_call_operand.vmem [shape: f32[4,8], index: 1, kind: input, shape index: {}]   ;;  %s2255_s2 = inlined_call_operand.vmem [shape: f32[512,8], index: 2, kind: output, shape index: {0}]   ;;  %s2256_s3 = inlined_call_operand.hbm [shape: f32[1,2,8], index: 3, kind: output, shape index: {1}]  }
   0x1   :  { %v142_v0 = vld [vmem:[%s2254_s1] sm:$0xf]  ;;  %v15_v2 = vld [vmem:[%s2253_s0 + $0x8] sm:$0xff]  ;;  %v16_v5 = vld [vmem:[%s2253_s0 + $0x10] sm:$0xff] }
   0x2   :  { %v14_v1 = vld [vmem:[%s2253_s0] sm:$0xff]  ;;  %1271 = vmatprep.subr.msk.mxu0 %vm336_vm0, %v142_v0  ;;  %v79_v4 = vmax.f32 %v15_v2, 0.0  ;;  %v17_v6 = vld [vmem:[%s2253_s0 + $0x18] sm:$0xff]  ;;  %1369 = vmatprep.subr.msk.mxu1 %vm336_vm0, %v142_v0  ;;  %v80_v7 = vmax.f32 %v16_v5, 0.0  ;;  %v19_v11 = vld [vmem:[%s2253_s0 + $0x28] sm:$0xff] }
   0x3   :  { %v78_v3 = vmax.f32 %v14_v1, 0.0  ;;  %1272 = vmatpush3.msk.msra.mxu0 %vm336_vm0, %v142_v0  ;;  %v18_v8 = vld [vmem:[%s2253_s0 + $0x20] sm:$0xff]  ;;  %1370 = vmatpush3.msk.msra.mxu1 %vm336_vm0, %v142_v0  ;;  %v81_v9 = vmax.f32 %v17_v6, 0.0  ;;  %v20_v12 = vld [vmem:[%s2253_s0 + $0x30] sm:$0xff]  ;;  %v83_v13 = vmax.f32 %v19_v11, 0.0  ;;  %v21_v15 = vld [vmem:[%s2253_s0 + $0x38] sm:$0xff] }
   0x4   :  { %v82_v10 = vmax.f32 %v18_v8, 0.0  ;;  %v84_v14 = vmax.f32 %v20_v12, 0.0  ;;  %v22_v16 = vld [vmem:[%s2253_s0 + $0x40] sm:$0xff]  ;;  %v47_v18 = vld [vmem:[%s2253_s0 + $0x108] sm:$0xff]  ;;  %v48_v19 = vld [vmem:[%s2253_s0 + $0x110] sm:$0xff]  ;;  %v85_v20 = vmax.f32 %v21_v15, 0.0 }
   0x5   :  { %1273 = vmatprep.mubr.msk.f32.mxu0 %vm143_vm1, %v78_v3  ;;  %v46_v17 = vld [vmem:[%s2253_s0 + $0x100] sm:$0xff]  ;;  %v111_v22 = vmax.f32 %v47_v18, 0.0  ;;  %v112_v23 = vmax.f32 %v48_v19, 0.0  ;;  %v49_v24 = vld [vmem:[%s2253_s0 + $0x118] sm:$0xff]  ;;  %v86_v25 = vmax.f32 %v22_v16, 0.0  ;;  %v23_v26 = vld [vmem:[%s2253_s0 + $0x48] sm:$0xff] }
   0x6   :  { %1274 = vmatmul.mubr.msk.f32.vlgmr.msra.gmra.mxu0 %vm143_vm1, %v79_v4  ;;  %v110_v21 = vmax.f32 %v46_v17, 0.0  ;;  %v50_v27 = vld [vmem:[%s2253_s0 + $0x120] sm:$0xff]  ;;  %v24_v28 = vld [vmem:[%s2253_s0 + $0x50] sm:$0xff]  ;;  %v113_v29 = vmax.f32 %v49_v24, 0.0  ;;  %v87_v30 = vmax.f32 %v23_v26, 0.0  ;;  %v51_v32 = vld [vmem:[%s2253_s0 + $0x128] sm:$0xff] }
   0x7   :  { %1276 = vmatprep.mubr.msk.f32.mxu0 %vm143_vm1, %v80_v7  ;;  %v114_v31 = vmax.f32 %v50_v27, 0.0  ;;  %v88_v33 = vmax.f32 %v24_v28, 0.0  ;;  %v25_v34 = vld [vmem:[%s2253_s0 + $0x58] sm:$0xff]  ;;  %v52_v35 = vld [vmem:[%s2253_s0 + $0x130] sm:$0xff]  ;;  %v26_v36 = vld [vmem:[%s2253_s0 + $0x60] sm:$0xff]  ;;  %v115_v37 = vmax.f32 %v51_v32, 0.0 }
   0x8   :  { %1321 = vmatprep.mubr.msk.f32.mxu1 %vm143_vm1, %v110_v21  ;;  %v89_v38 = vmax.f32 %v25_v34, 0.0  ;;  %v116_v39 = vmax.f32 %v52_v35, 0.0  ;;  %v53_v40 = vld [vmem:[%s2253_s0 + $0x138] sm:$0xff]  ;;  %v90_v41 = vmax.f32 %v26_v36, 0.0  ;;  %v27_v42 = vld [vmem:[%s2253_s0 + $0x68] sm:$0xff]  ;;  %v54_v43 = vld [vmem:[%s2253_s0 + $0x140] sm:$0xff] }
   0x9   :  { %1322 = vmatmul.mubr.msk.f32.vlgmr.msra.gmra.mxu1 %vm143_vm1, %v111_v22  ;;  %v28_v44 = vld [vmem:[%s2253_s0 + $0x70] sm:$0xff] }
   0xa   :  { %1277 = vmatmul.mubr.msk.f32.gmra.mxu0 %vm143_vm1, %v81_v9  ;;  %1324 = vmatprep.mubr.msk.f32.mxu1 %vm143_vm1, %v112_v23 }
   0xb   :  { %1279 = vmatprep.mubr.msk.f32.mxu0 %vm143_vm1, %v82_v10 }
   0xd   :  { %1325 = vmatmul.mubr.msk.f32.gmra.mxu1 %vm143_vm1, %v113_v29 }
   0xe   :  { %1280 = vmatmul.mubr.msk.f32.gmra.mxu0 %vm143_vm1, %v83_v13  ;;  %1327 = vmatprep.mubr.msk.f32.mxu1 %vm143_vm1, %v114_v31 }
   0xf   :  { %1282 = vmatprep.mubr.msk.f32.mxu0 %vm143_vm1, %v84_v14 }
  0x12   :  { %1283 = vmatmul.mubr.msk.f32.gmra.mxu0 %vm143_vm1, %v85_v20 }
  0x13   :  { %1285 = vmatprep.mubr.msk.f32.mxu0 %vm143_vm1, %v86_v25 }
  0x16   :  { %1286 = vmatmul.mubr.msk.f32.gmra.mxu0 %vm143_vm1, %v87_v30 }
  0x17   :  { %1288 = vmatprep.mubr.msk.f32.mxu0 %vm143_vm1, %v88_v33 }
  0x18   :  { %9 = vsyncpa [#allocation3], 0  ;;  %1328 = vmatmul.mubr.msk.f32.gmra.mxu1 %vm143_vm1, %v115_v37  ;;  %v117_v45 = vmax.f32 %v53_v40, 0.0  ;;  %v91_v46 = vmax.f32 %v27_v42, 0.0  ;;  %v118_v47 = vmax.f32 %v54_v43, 0.0  ;;  %v55_v48 = vld [vmem:[%s2253_s0 + $0x148] sm:$0xff] }
  0x19   :  { %1330 = vmatprep.mubr.msk.f32.mxu1 %vm143_vm1, %v116_v39  ;;  %v92_v49 = vmax.f32 %v28_v44, 0.0  ;;  %v29_v50 = vld [vmem:[%s2253_s0 + $0x78] sm:$0xff]  ;;  %v56_v51 = vld [vmem:[%s2253_s0 + $0x150] sm:$0xff]  ;;  %v30_v52 = vld [vmem:[%s2253_s0 + $0x80] sm:$0xff]  ;;  %v119_v53 = vmax.f32 %v55_v48, 0.0  ;;  %vm725_vm2 = vcmask 64512  }
  0x1a   :  { %1289 = vmatmul.mubr.msk.f32.gmra.mxu0 %vm143_vm1, %v89_v38  ;;  %v93_v54 = vmax.f32 %v29_v50, 0.0  ;;  %v120_v55 = vmax.f32 %v56_v51, 0.0  ;;  %v57_v56 = vld [vmem:[%s2253_s0 + $0x158] sm:$0xff]  ;;  %v94_v57 = vmax.f32 %v30_v52, 0.0  ;;  %v31_v58 = vld [vmem:[%s2253_s0 + $0x88] sm:$0xff]  ;;  %v58_v59 = vld [vmem:[%s2253_s0 + $0x160] sm:$0xff] }
  0x1b   :  { %1291 = vmatprep.mubr.msk.f32.mxu0 %vm143_vm1, %v90_v41  ;;  %v32_v60 = vld [vmem:[%s2253_s0 + $0x90] sm:$0xff]  ;;  %v121_v61 = vmax.f32 %v57_v56, 0.0  ;;  %v95_v62 = vmax.f32 %v31_v58, 0.0  ;;  %v122_v63 = vmax.f32 %v58_v59, 0.0  ;;  %v59_v0 = vld [vmem:[%s2253_s0 + $0x168] sm:$0xff]  ;;  %v33_v2 = vld [vmem:[%s2253_s0 + $0x98] sm:$0xff] }
  0x1c   :  { %1331 = vmatmul.mubr.msk.f32.gmra.mxu1 %vm143_vm1, %v117_v45  ;;  %v96_v1 = vmax.f32 %v32_v60, 0.0  ;;  %v60_v3 = vld [vmem:[%s2253_s0 + $0x170] sm:$0xff]  ;;  %v34_v4 = vld [vmem:[%s2253_s0 + $0xa0] sm:$0xff]  ;;  %v123_v5 = vmax.f32 %v59_v0, 0.0  ;;  %v97_v6 = vmax.f32 %v33_v2, 0.0  ;;  %v61_v8 = vld [vmem:[%s2253_s0 + $0x178] sm:$0xff] }
  0x1d   :  { %1333 = vmatprep.mubr.msk.f32.mxu1 %vm143_vm1, %v118_v47  ;;  %v124_v7 = vmax.f32 %v60_v3, 0.0  ;;  %v98_v9 = vmax.f32 %v34_v4, 0.0  ;;  %v35_v10 = vld [vmem:[%s2253_s0 + $0xa8] sm:$0xff]  ;;  %v62_v11 = vld [vmem:[%s2253_s0 + $0x180] sm:$0xff]  ;;  %v36_v12 = vld [vmem:[%s2253_s0 + $0xb0] sm:$0xff]  ;;  %v125_v13 = vmax.f32 %v61_v8, 0.0 }
  0x1e   :  { %1292 = vmatmul.mubr.msk.f32.gmra.mxu0 %vm143_vm1, %v91_v46  ;;  %v99_v14 = vmax.f32 %v35_v10, 0.0  ;;  %v126_v15 = vmax.f32 %v62_v11, 0.0  ;;  %v63_v16 = vld [vmem:[%s2253_s0 + $0x188] sm:$0xff]  ;;  %v100_v17 = vmax.f32 %v36_v12, 0.0  ;;  %v37_v18 = vld [vmem:[%s2253_s0 + $0xb8] sm:$0xff]  ;;  %v64_v19 = vld [vmem:[%s2253_s0 + $0x190] sm:$0xff] }
  0x1f   :  { %1294 = vmatprep.mubr.msk.f32.mxu0 %vm143_vm1, %v92_v49  ;;  %v38_v20 = vld [vmem:[%s2253_s0 + $0xc0] sm:$0xff]  ;;  %v127_v21 = vmax.f32 %v63_v16, 0.0  ;;  %v101_v22 = vmax.f32 %v37_v18, 0.0  ;;  %v128_v23 = vmax.f32 %v64_v19, 0.0  ;;  %v65_v24 = vld [vmem:[%s2253_s0 + $0x198] sm:$0xff]  ;;  %v39_v26 = vld [vmem:[%s2253_s0 + $0xc8] sm:$0xff] }
  0x20   :  { %1334 = vmatmul.mubr.msk.f32.gmra.mxu1 %vm143_vm1, %v119_v53  ;;  %v102_v25 = vmax.f32 %v38_v20, 0.0  ;;  %v66_v27 = vld [vmem:[%s2253_s0 + $0x1a0] sm:$0xff]  ;;  %v40_v28 = vld [vmem:[%s2253_s0 + $0xd0] sm:$0xff]  ;;  %v129_v29 = vmax.f32 %v65_v24, 0.0  ;;  %v103_v30 = vmax.f32 %v39_v26, 0.0  ;;  %v67_v32 = vld [vmem:[%s2253_s0 + $0x1a8] sm:$0xff] }
  0x21   :  { %1336 = vmatprep.mubr.msk.f32.mxu1 %vm143_vm1, %v120_v55  ;;  %v130_v31 = vmax.f32 %v66_v27, 0.0  ;;  %v104_v33 = vmax.f32 %v40_v28, 0.0  ;;  %v41_v34 = vld [vmem:[%s2253_s0 + $0xd8] sm:$0xff]  ;;  %v68_v35 = vld [vmem:[%s2253_s0 + $0x1b0] sm:$0xff]  ;;  %v42_v36 = vld [vmem:[%s2253_s0 + $0xe0] sm:$0xff]  ;;  %v131_v37 = vmax.f32 %v67_v32, 0.0 }
  0x22   :  { %1295 = vmatmul.mubr.msk.f32.gmra.mxu0 %vm143_vm1, %v93_v54  ;;  %v105_v38 = vmax.f32 %v41_v34, 0.0  ;;  %v132_v39 = vmax.f32 %v68_v35, 0.0  ;;  %v69_v40 = vld [vmem:[%s2253_s0 + $0x1b8] sm:$0xff]  ;;  %v106_v41 = vmax.f32 %v42_v36, 0.0  ;;  %v43_v42 = vld [vmem:[%s2253_s0 + $0xe8] sm:$0xff]  ;;  %v70_v43 = vld [vmem:[%s2253_s0 + $0x1c0] sm:$0xff] }
  0x23   :  { %1297 = vmatprep.mubr.msk.f32.mxu0 %vm143_vm1, %v94_v57  ;;  %v44_v44 = vld [vmem:[%s2253_s0 + $0xf0] sm:$0xff]  ;;  %v133_v45 = vmax.f32 %v69_v40, 0.0  ;;  %v107_v46 = vmax.f32 %v43_v42, 0.0  ;;  %v134_v47 = vmax.f32 %v70_v43, 0.0  ;;  %v71_v48 = vld [vmem:[%s2253_s0 + $0x1c8] sm:$0xff]  ;;  %v45_v50 = vld [vmem:[%s2253_s0 + $0xf8] sm:$0xff] }
  0x24   :  { %1337 = vmatmul.mubr.msk.f32.gmra.mxu1 %vm143_vm1, %v121_v61  ;;  %v108_v49 = vmax.f32 %v44_v44, 0.0  ;;  %v72_v51 = vld [vmem:[%s2253_s0 + $0x1d0] sm:$0xff]  ;;  %v135_v52 = vmax.f32 %v71_v48, 0.0  ;;  %v109_v53 = vmax.f32 %v45_v50, 0.0  ;;  %v73_v55 = vld [vmem:[%s2253_s0 + $0x1d8] sm:$0xff]  ;;  %v74_v56 = vld [vmem:[%s2253_s0 + $0x1e0] sm:$0xff] }
  0x25   :  { %1339 = vmatprep.mubr.msk.f32.mxu1 %vm143_vm1, %v122_v63  ;;  %v136_v54 = vmax.f32 %v72_v51, 0.0  ;;  %v137_v57 = vmax.f32 %v73_v55, 0.0  ;;  %v138_v58 = vmax.f32 %v74_v56, 0.0  ;;  %v75_v59 = vld [vmem:[%s2253_s0 + $0x1e8] sm:$0xff]  ;;  %v76_v60 = vld [vmem:[%s2253_s0 + $0x1f0] sm:$0xff]  ;;  %v77_v63 = vld [vmem:[%s2253_s0 + $0x1f8] sm:$0xff] }
  0x26   :  { %1298 = vmatmul.mubr.msk.f32.gmra.mxu0 %vm143_vm1, %v95_v62  ;;  %v139_v61 = vmax.f32 %v75_v59, 0.0  ;;  %v140_v62 = vmax.f32 %v76_v60, 0.0  ;;  %v141_v0 = vmax.f32 %v77_v63, 0.0  ;;  %vm923_vm3 = vcmask 57344  }
  0x27   :  { %1300 = vmatprep.mubr.msk.f32.mxu0 %vm143_vm1, %v96_v1 }
  0x28   :  { %1340 = vmatmul.mubr.msk.f32.gmra.mxu1 %vm143_vm1, %v123_v5 }
  0x29   :  { %1342 = vmatprep.mubr.msk.f32.mxu1 %vm143_vm1, %v124_v7 }
  0x2a   :  { %1301 = vmatmul.mubr.msk.f32.gmra.mxu0 %vm143_vm1, %v97_v6 }
  0x2b   :  { %1303 = vmatprep.mubr.msk.f32.mxu0 %vm143_vm1, %v98_v9 }
  0x2c   :  { %1343 = vmatmul.mubr.msk.f32.gmra.mxu1 %vm143_vm1, %v125_v13 }
  0x2d   :  { %1345 = vmatprep.mubr.msk.f32.mxu1 %vm143_vm1, %v126_v15 }
  0x2e   :  { %1304 = vmatmul.mubr.msk.f32.gmra.mxu0 %vm143_vm1, %v99_v14 }
  0x2f   :  { %1306 = vmatprep.mubr.msk.f32.mxu0 %vm143_vm1, %v100_v17 }
  0x30   :  { %1346 = vmatmul.mubr.msk.f32.gmra.mxu1 %vm143_vm1, %v127_v21 }
  0x31   :  { %1348 = vmatprep.mubr.msk.f32.mxu1 %vm143_vm1, %v128_v23 }
  0x32   :  { %1307 = vmatmul.mubr.msk.f32.gmra.mxu0 %vm143_vm1, %v101_v22 }
  0x33   :  { %1309 = vmatprep.mubr.msk.f32.mxu0 %vm143_vm1, %v102_v25 }
  0x34   :  { %1349 = vmatmul.mubr.msk.f32.gmra.mxu1 %vm143_vm1, %v129_v29 }
  0x35   :  { %1351 = vmatprep.mubr.msk.f32.mxu1 %vm143_vm1, %v130_v31 }
  0x36   :  { %1310 = vmatmul.mubr.msk.f32.gmra.mxu0 %vm143_vm1, %v103_v30 }
  0x37   :  { %1312 = vmatprep.mubr.msk.f32.mxu0 %vm143_vm1, %v104_v33 }
  0x38   :  { %1352 = vmatmul.mubr.msk.f32.gmra.mxu1 %vm143_vm1, %v131_v37 }
  0x39   :  { %1354 = vmatprep.mubr.msk.f32.mxu1 %vm143_vm1, %v132_v39 }
  0x3a   :  { %1313 = vmatmul.mubr.msk.f32.gmra.mxu0 %vm143_vm1, %v105_v38 }
  0x3b   :  { %1315 = vmatprep.mubr.msk.f32.mxu0 %vm143_vm1, %v106_v41 }
  0x3c   :  { %1355 = vmatmul.mubr.msk.f32.gmra.mxu1 %vm143_vm1, %v133_v45 }
  0x3d   :  { %1357 = vmatprep.mubr.msk.f32.mxu1 %vm143_vm1, %v134_v47 }
  0x3e   :  { %1316 = vmatmul.mubr.msk.f32.gmra.mxu0 %vm143_vm1, %v107_v46 }
  0x3f   :  { %1318 = vmatprep.mubr.msk.f32.mxu0 %vm143_vm1, %v108_v49 }
  0x40   :  { %1358 = vmatmul.mubr.msk.f32.gmra.mxu1 %vm143_vm1, %v135_v52 }
  0x41   :  { %1360 = vmatprep.mubr.msk.f32.mxu1 %vm143_vm1, %v136_v54 }
  0x42   :  { %1319 = vmatmul.mubr.msk.f32.gmra.mxu0 %vm143_vm1, %v109_v53 }
  0x44   :  { %1361 = vmatmul.mubr.msk.f32.gmra.mxu1 %vm143_vm1, %v137_v57 }
  0x45   :  { %1363 = vmatprep.mubr.msk.f32.mxu1 %vm143_vm1, %v138_v58 }
  0x48   :  { %1364 = vmatmul.mubr.msk.f32.gmra.mxu1 %vm143_vm1, %v139_v61 }
  0x49   :  { %1366 = vmatprep.mubr.msk.f32.mxu1 %vm143_vm1, %v140_v62 }
  0x4c   :  { %1367 = vmatmul.mubr.msk.f32.gmra.mxu1 %vm143_vm1, %v141_v0 }
  0xc6   :  { %v1275_v1 = vpop.f32.mrf.mxu0 }
  0xc7   :  { %727 = vst.msk [vmem:[%s2255_s2 + $0x8] sm:$0xff] %vm725_vm2, %v1275_v1  ;;  %v926_v3 = vmul.f32 %v1275_v1, %v1275_v1  ;;  %v791_v7 = vsel %vm725_vm2, %v1275_v1, 0.0 }
  0xc8   :  { %v406_v2 = vpop.f32.mrf.mxu0 }
  0xc9   :  { %726 = vst.msk [vmem:[%s2255_s2] sm:$0xff] %vm725_vm2, %v406_v2  ;;  %v790_v4 = vsel %vm725_vm2, %v406_v2, 0.0  ;;  %v925_v5 = vmul.f32 %v406_v2, %v406_v2  ;;  %v990_v11 = vsel %vm725_vm2, %v926_v3, 0.0  ;;  %v1707_v27 = vpop.f32.mrf.mxu1 }
  0xca   :  { %v1278_v6 = vpop.f32.mrf.mxu0  ;;  %v792_v9 = vadd.f32 %v791_v7, %v790_v4  ;;  %759 = vst.msk [vmem:[%s2255_s2 + $0x108] sm:$0xff] %vm725_vm2, %v1707_v27 }
  0xcb   :  { %v989_v8 = vsel %vm725_vm2, %v925_v5, 0.0  ;;  %729 = vst.msk [vmem:[%s2255_s2 + $0x18] sm:$0xff] %vm725_vm2, %v1278_v6  ;;  %v928_v12 = vmul.f32 %v1278_v6, %v1278_v6  ;;  %v795_v18 = vsel %vm725_vm2, %v1278_v6, 0.0  ;;  %v1720_v33 = vpop.f32.mrf.mxu1 }
  0xcc   :  { %v416_v10 = vpop.f32.mrf.mxu0  ;;  %v991_v15 = vadd.f32 %v990_v11, %v989_v8  ;;  %758 = vst.msk [vmem:[%s2255_s2 + $0x100] sm:$0xff] %vm725_vm2, %v1720_v33 }
  0xcd   :  { %728 = vst.msk [vmem:[%s2255_s2 + $0x10] sm:$0xff] %vm725_vm2, %v416_v10  ;;  %v793_v13 = vsel %vm725_vm2, %v416_v10, 0.0  ;;  %v927_v14 = vmul.f32 %v416_v10, %v416_v10  ;;  %v994_v23 = vsel %vm725_vm2, %v928_v12, 0.0  ;;  %v1733_v41 = vpop.f32.mrf.mxu1 }
  0xce   :  { %v794_v16 = vadd.f32 %v793_v13, %v792_v9  ;;  %v1281_v17 = vpop.f32.mrf.mxu0  ;;  %761 = vst.msk [vmem:[%s2255_s2 + $0x118] sm:$0xff] %vm725_vm2, %v1733_v41 }
  0xcf   :  { %v992_v19 = vsel %vm725_vm2, %v927_v14, 0.0  ;;  %731 = vst.msk [vmem:[%s2255_s2 + $0x28] sm:$0xff] %vm725_vm2, %v1281_v17  ;;  %v930_v24 = vmul.f32 %v1281_v17, %v1281_v17  ;;  %v799_v31 = vsel %vm725_vm2, %v1281_v17, 0.0  ;;  %v1746_v47 = vpop.f32.mrf.mxu1 }
  0xd0   :  { %v993_v20 = vadd.f32 %v992_v19, %v991_v15  ;;  %v426_v21 = vpop.f32.mrf.mxu0  ;;  %v796_v22 = vadd.f32 %v795_v18, %v794_v16  ;;  %760 = vst.msk [vmem:[%s2255_s2 + $0x110] sm:$0xff] %vm725_vm2, %v1746_v47 }
  0xd1   :  { %730 = vst.msk [vmem:[%s2255_s2 + $0x20] sm:$0xff] %vm725_vm2, %v426_v21  ;;  %v797_v25 = vsel %vm725_vm2, %v426_v21, 0.0  ;;  %v929_v26 = vmul.f32 %v426_v21, %v426_v21  ;;  %v998_v37 = vsel %vm725_vm2, %v930_v24, 0.0 }
  0xd2   :  { %v798_v28 = vadd.f32 %v797_v25, %v796_v22  ;;  %v995_v29 = vadd.f32 %v994_v23, %v993_v20  ;;  %v1284_v30 = vpop.f32.mrf.mxu0 }
  0xd3   :  { %v996_v32 = vsel %vm725_vm2, %v929_v26, 0.0  ;;  %733 = vst.msk [vmem:[%s2255_s2 + $0x38] sm:$0xff] %vm725_vm2, %v1284_v30  ;;  %v932_v38 = vmul.f32 %v1284_v30, %v1284_v30  ;;  %v803_v45 = vsel %vm725_vm2, %v1284_v30, 0.0 }
  0xd4   :  { %v997_v34 = vadd.f32 %v996_v32, %v995_v29  ;;  %v436_v35 = vpop.f32.mrf.mxu0  ;;  %v800_v36 = vadd.f32 %v799_v31, %v798_v28 }
  0xd5   :  { %732 = vst.msk [vmem:[%s2255_s2 + $0x30] sm:$0xff] %vm725_vm2, %v436_v35  ;;  %v801_v39 = vsel %vm725_vm2, %v436_v35, 0.0  ;;  %v931_v40 = vmul.f32 %v436_v35, %v436_v35  ;;  %v1002_v51 = vsel %vm725_vm2, %v932_v38, 0.0 }
  0xd6   :  { %v802_v42 = vadd.f32 %v801_v39, %v800_v36  ;;  %v999_v43 = vadd.f32 %v998_v37, %v997_v34  ;;  %v1287_v44 = vpop.f32.mrf.mxu0 }
  0xd7   :  { %v1000_v46 = vsel %vm725_vm2, %v931_v40, 0.0  ;;  %735 = vst.msk [vmem:[%s2255_s2 + $0x48] sm:$0xff] %vm725_vm2, %v1287_v44  ;;  %v934_v52 = vmul.f32 %v1287_v44, %v1287_v44  ;;  %v807_v59 = vsel %vm725_vm2, %v1287_v44, 0.0 }
  0xd8   :  { %v1001_v48 = vadd.f32 %v1000_v46, %v999_v43  ;;  %v446_v49 = vpop.f32.mrf.mxu0  ;;  %v804_v50 = vadd.f32 %v803_v45, %v802_v42  ;;  %v1759_v55 = vpop.f32.mrf.mxu1 }
  0xd9   :  { %734 = vst.msk [vmem:[%s2255_s2 + $0x40] sm:$0xff] %vm725_vm2, %v446_v49  ;;  %v805_v53 = vsel %vm725_vm2, %v446_v49, 0.0  ;;  %v933_v54 = vmul.f32 %v446_v49, %v446_v49  ;;  %763 = vst.msk [vmem:[%s2255_s2 + $0x128] sm:$0xff] %vm725_vm2, %v1759_v55  ;;  %v1006_v1 = vsel %vm725_vm2, %v934_v52, 0.0 }
  0xda   :  { %v806_v56 = vadd.f32 %v805_v53, %v804_v50  ;;  %v1003_v57 = vadd.f32 %v1002_v51, %v1001_v48  ;;  %v1290_v58 = vpop.f32.mrf.mxu0  ;;  %v1772_v61 = vpop.f32.mrf.mxu1 }
  0xdb   :  { %v1004_v60 = vsel %vm725_vm2, %v933_v54, 0.0  ;;  %737 = vst.msk [vmem:[%s2255_s2 + $0x58] sm:$0xff] %vm725_vm2, %v1290_v58  ;;  %762 = vst.msk [vmem:[%s2255_s2 + $0x120] sm:$0xff] %vm725_vm2, %v1772_v61  ;;  %v936_v2 = vmul.f32 %v1290_v58, %v1290_v58  ;;  %v811_v9 = vsel %vm725_vm2, %v1290_v58, 0.0 }
  0xdc   :  { %v1005_v62 = vadd.f32 %v1004_v60, %v1003_v57  ;;  %v456_v63 = vpop.f32.mrf.mxu0  ;;  %v808_v0 = vadd.f32 %v807_v59, %v806_v56  ;;  %v1785_v5 = vpop.f32.mrf.mxu1 }
  0xdd   :  { %736 = vst.msk [vmem:[%s2255_s2 + $0x50] sm:$0xff] %vm725_vm2, %v456_v63  ;;  %v809_v3 = vsel %vm725_vm2, %v456_v63, 0.0  ;;  %v935_v4 = vmul.f32 %v456_v63, %v456_v63  ;;  %765 = vst.msk [vmem:[%s2255_s2 + $0x138] sm:$0xff] %vm725_vm2, %v1785_v5  ;;  %v1010_v15 = vsel %vm725_vm2, %v936_v2, 0.0 }
  0xde   :  { %v810_v6 = vadd.f32 %v809_v3, %v808_v0  ;;  %v1007_v7 = vadd.f32 %v1006_v1, %v1005_v62  ;;  %v1293_v8 = vpop.f32.mrf.mxu0  ;;  %v1798_v11 = vpop.f32.mrf.mxu1 }
  0xdf   :  { %v1008_v10 = vsel %vm725_vm2, %v935_v4, 0.0  ;;  %739 = vst.msk [vmem:[%s2255_s2 + $0x68] sm:$0xff] %vm725_vm2, %v1293_v8  ;;  %764 = vst.msk [vmem:[%s2255_s2 + $0x130] sm:$0xff] %vm725_vm2, %v1798_v11  ;;  %v938_v16 = vmul.f32 %v1293_v8, %v1293_v8  ;;  %v815_v23 = vsel %vm725_vm2, %v1293_v8, 0.0 }
  0xe0   :  { %v1009_v12 = vadd.f32 %v1008_v10, %v1007_v7  ;;  %v466_v13 = vpop.f32.mrf.mxu0  ;;  %v812_v14 = vadd.f32 %v811_v9, %v810_v6  ;;  %v1811_v19 = vpop.f32.mrf.mxu1 }
  0xe1   :  { %738 = vst.msk [vmem:[%s2255_s2 + $0x60] sm:$0xff] %vm725_vm2, %v466_v13  ;;  %v813_v17 = vsel %vm725_vm2, %v466_v13, 0.0  ;;  %v937_v18 = vmul.f32 %v466_v13, %v466_v13  ;;  %767 = vst.msk [vmem:[%s2255_s2 + $0x148] sm:$0xff] %vm725_vm2, %v1811_v19  ;;  %v1014_v30 = vsel %vm725_vm2, %v938_v16, 0.0 }
  0xe2   :  { %v814_v20 = vadd.f32 %v813_v17, %v812_v14  ;;  %v1011_v21 = vadd.f32 %v1010_v15, %v1009_v12  ;;  %v1296_v22 = vpop.f32.mrf.mxu0  ;;  %v1824_v25 = vpop.f32.mrf.mxu1 }
  0xe3   :  { %v1012_v24 = vsel %vm725_vm2, %v937_v18, 0.0  ;;  %741 = vst.msk [vmem:[%s2255_s2 + $0x78] sm:$0xff] %vm725_vm2, %v1296_v22  ;;  %766 = vst.msk [vmem:[%s2255_s2 + $0x140] sm:$0xff] %vm725_vm2, %v1824_v25  ;;  %v940_v31 = vmul.f32 %v1296_v22, %v1296_v22  ;;  %v819_v39 = vsel %vm725_vm2, %v1296_v22, 0.0 }
  0xe4   :  { %v1013_v26 = vadd.f32 %v1012_v24, %v1011_v21  ;;  %v476_v28 = vpop.f32.mrf.mxu0  ;;  %v816_v29 = vadd.f32 %v815_v23, %v814_v20  ;;  %v1837_v35 = vpop.f32.mrf.mxu1 }
  0xe5   :  { %740 = vst.msk [vmem:[%s2255_s2 + $0x70] sm:$0xff] %vm725_vm2, %v476_v28  ;;  %v817_v32 = vsel %vm725_vm2, %v476_v28, 0.0  ;;  %v939_v34 = vmul.f32 %v476_v28, %v476_v28  ;;  %769 = vst.msk [vmem:[%s2255_s2 + $0x158] sm:$0xff] %vm725_vm2, %v1837_v35  ;;  %v1018_v46 = vsel %vm725_vm2, %v940_v31, 0.0 }
  0xe6   :  { %v818_v36 = vadd.f32 %v817_v32, %v816_v29  ;;  %v1015_v37 = vadd.f32 %v1014_v30, %v1013_v26  ;;  %v1299_v38 = vpop.f32.mrf.mxu0  ;;  %v1850_v42 = vpop.f32.mrf.mxu1 }
  0xe7   :  { %v1016_v40 = vsel %vm725_vm2, %v939_v34, 0.0  ;;  %743 = vst.msk [vmem:[%s2255_s2 + $0x88] sm:$0xff] %vm725_vm2, %v1299_v38  ;;  %768 = vst.msk [vmem:[%s2255_s2 + $0x150] sm:$0xff] %vm725_vm2, %v1850_v42  ;;  %v942_v48 = vmul.f32 %v1299_v38, %v1299_v38  ;;  %v823_v56 = vsel %vm725_vm2, %v1299_v38, 0.0 }
  0xe8   :  { %v1017_v43 = vadd.f32 %v1016_v40, %v1015_v37  ;;  %v486_v44 = vpop.f32.mrf.mxu0  ;;  %v820_v45 = vadd.f32 %v819_v39, %v818_v36  ;;  %v1863_v51 = vpop.f32.mrf.mxu1 }
  0xe9   :  { %742 = vst.msk [vmem:[%s2255_s2 + $0x80] sm:$0xff] %vm725_vm2, %v486_v44  ;;  %v821_v49 = vsel %vm725_vm2, %v486_v44, 0.0  ;;  %v941_v50 = vmul.f32 %v486_v44, %v486_v44  ;;  %771 = vst.msk [vmem:[%s2255_s2 + $0x168] sm:$0xff] %vm725_vm2, %v1863_v51  ;;  %v1022_v63 = vsel %vm725_vm2, %v942_v48, 0.0 }
  0xea   :  { %v822_v52 = vadd.f32 %v821_v49, %v820_v45  ;;  %v1019_v53 = vadd.f32 %v1018_v46, %v1017_v43  ;;  %v1302_v54 = vpop.f32.mrf.mxu0  ;;  %v1876_v58 = vpop.f32.mrf.mxu1 }
  0xeb   :  { %v1020_v57 = vsel %vm725_vm2, %v941_v50, 0.0  ;;  %745 = vst.msk [vmem:[%s2255_s2 + $0x98] sm:$0xff] %vm725_vm2, %v1302_v54  ;;  %770 = vst.msk [vmem:[%s2255_s2 + $0x160] sm:$0xff] %vm725_vm2, %v1876_v58  ;;  %v944_v0 = vmul.f32 %v1302_v54, %v1302_v54  ;;  %v827_v8 = vsel %vm725_vm2, %v1302_v54, 0.0 }
  0xec   :  { %v1021_v59 = vadd.f32 %v1020_v57, %v1019_v53  ;;  %v496_v60 = vpop.f32.mrf.mxu0  ;;  %v824_v62 = vadd.f32 %v823_v56, %v822_v52  ;;  %v1889_v3 = vpop.f32.mrf.mxu1 }
  0xed   :  { %744 = vst.msk [vmem:[%s2255_s2 + $0x90] sm:$0xff] %vm725_vm2, %v496_v60  ;;  %v825_v1 = vsel %vm725_vm2, %v496_v60, 0.0  ;;  %v943_v2 = vmul.f32 %v496_v60, %v496_v60  ;;  %773 = vst.msk [vmem:[%s2255_s2 + $0x178] sm:$0xff] %vm725_vm2, %v1889_v3  ;;  %v1026_v15 = vsel %vm725_vm2, %v944_v0, 0.0 }
  0xee   :  { %v826_v4 = vadd.f32 %v825_v1, %v824_v62  ;;  %v1023_v6 = vadd.f32 %v1022_v63, %v1021_v59  ;;  %v1305_v7 = vpop.f32.mrf.mxu0  ;;  %v1902_v10 = vpop.f32.mrf.mxu1 }
  0xef   :  { %v1024_v9 = vsel %vm725_vm2, %v943_v2, 0.0  ;;  %747 = vst.msk [vmem:[%s2255_s2 + $0xa8] sm:$0xff] %vm725_vm2, %v1305_v7  ;;  %772 = vst.msk [vmem:[%s2255_s2 + $0x170] sm:$0xff] %vm725_vm2, %v1902_v10  ;;  %v946_v16 = vmul.f32 %v1305_v7, %v1305_v7  ;;  %v831_v24 = vsel %vm725_vm2, %v1305_v7, 0.0 }
  0xf0   :  { %v1025_v12 = vadd.f32 %v1024_v9, %v1023_v6  ;;  %v506_v13 = vpop.f32.mrf.mxu0  ;;  %v828_v14 = vadd.f32 %v827_v8, %v826_v4  ;;  %v1915_v20 = vpop.f32.mrf.mxu1 }
  0xf1   :  { %746 = vst.msk [vmem:[%s2255_s2 + $0xa0] sm:$0xff] %vm725_vm2, %v506_v13  ;;  %v829_v17 = vsel %vm725_vm2, %v506_v13, 0.0  ;;  %v945_v18 = vmul.f32 %v506_v13, %v506_v13  ;;  %775 = vst.msk [vmem:[%s2255_s2 + $0x188] sm:$0xff] %vm725_vm2, %v1915_v20  ;;  %v1030_v32 = vsel %vm725_vm2, %v946_v16, 0.0 }
  0xf2   :  { %v830_v21 = vadd.f32 %v829_v17, %v828_v14  ;;  %v1027_v22 = vadd.f32 %v1026_v15, %v1025_v12  ;;  %v1308_v23 = vpop.f32.mrf.mxu0  ;;  %v1928_v28 = vpop.f32.mrf.mxu1 }
  0xf3   :  { %v1028_v26 = vsel %vm725_vm2, %v945_v18, 0.0  ;;  %749 = vst.msk [vmem:[%s2255_s2 + $0xb8] sm:$0xff] %vm725_vm2, %v1308_v23  ;;  %774 = vst.msk [vmem:[%s2255_s2 + $0x180] sm:$0xff] %vm725_vm2, %v1928_v28  ;;  %v948_v34 = vmul.f32 %v1308_v23, %v1308_v23  ;;  %v835_v44 = vsel %vm725_vm2, %v1308_v23, 0.0 }
  0xf4   :  { %v1029_v29 = vadd.f32 %v1028_v26, %v1027_v22  ;;  %v516_v30 = vpop.f32.mrf.mxu0  ;;  %v832_v31 = vadd.f32 %v831_v24, %v830_v21  ;;  %v1941_v38 = vpop.f32.mrf.mxu1 }
  0xf5   :  { %748 = vst.msk [vmem:[%s2255_s2 + $0xb0] sm:$0xff] %vm725_vm2, %v516_v30  ;;  %v833_v36 = vsel %vm725_vm2, %v516_v30, 0.0  ;;  %v947_v37 = vmul.f32 %v516_v30, %v516_v30  ;;  %777 = vst.msk [vmem:[%s2255_s2 + $0x198] sm:$0xff] %vm725_vm2, %v1941_v38  ;;  %v1034_v52 = vsel %vm725_vm2, %v948_v34, 0.0 }
  0xf6   :  { %v834_v39 = vadd.f32 %v833_v36, %v832_v31  ;;  %v1031_v40 = vadd.f32 %v1030_v32, %v1029_v29  ;;  %v1311_v43 = vpop.f32.mrf.mxu0  ;;  %v1954_v46 = vpop.f32.mrf.mxu1 }
  0xf7   :  { %v1032_v45 = vsel %vm725_vm2, %v947_v37, 0.0  ;;  %751 = vst.msk [vmem:[%s2255_s2 + $0xc8] sm:$0xff] %vm725_vm2, %v1311_v43  ;;  %776 = vst.msk [vmem:[%s2255_s2 + $0x190] sm:$0xff] %vm725_vm2, %v1954_v46  ;;  %v950_v53 = vmul.f32 %v1311_v43, %v1311_v43  ;;  %v839_v63 = vsel %vm725_vm2, %v1311_v43, 0.0 }
  0xf8   :  { %v1033_v48 = vadd.f32 %v1032_v45, %v1031_v40  ;;  %v526_v49 = vpop.f32.mrf.mxu0  ;;  %v836_v50 = vadd.f32 %v835_v44, %v834_v39  ;;  %v1967_v57 = vpop.f32.mrf.mxu1 }
  0xf9   :  { %750 = vst.msk [vmem:[%s2255_s2 + $0xc0] sm:$0xff] %vm725_vm2, %v526_v49  ;;  %v837_v54 = vsel %vm725_vm2, %v526_v49, 0.0  ;;  %v949_v56 = vmul.f32 %v526_v49, %v526_v49  ;;  %779 = vst.msk [vmem:[%s2255_s2 + $0x1a8] sm:$0xff] %vm725_vm2, %v1967_v57  ;;  %v1038_v7 = vsel %vm725_vm2, %v950_v53, 0.0 }
  0xfa   :  { %v838_v59 = vadd.f32 %v837_v54, %v836_v50  ;;  %v1035_v60 = vadd.f32 %v1034_v52, %v1033_v48  ;;  %v1314_v62 = vpop.f32.mrf.mxu0  ;;  %v1980_v1 = vpop.f32.mrf.mxu1 }
  0xfb   :  { %v1036_v0 = vsel %vm725_vm2, %v949_v56, 0.0  ;;  %753 = vst.msk [vmem:[%s2255_s2 + $0xd8] sm:$0xff] %vm725_vm2, %v1314_v62  ;;  %778 = vst.msk [vmem:[%s2255_s2 + $0x1a0] sm:$0xff] %vm725_vm2, %v1980_v1  ;;  %v952_v8 = vmul.f32 %v1314_v62, %v1314_v62  ;;  %v843_v17 = vsel %vm725_vm2, %v1314_v62, 0.0 }
  0xfc   :  { %v1037_v2 = vadd.f32 %v1036_v0, %v1035_v60  ;;  %v536_v4 = vpop.f32.mrf.mxu0  ;;  %v840_v6 = vadd.f32 %v839_v63, %v838_v59  ;;  %v1993_v13 = vpop.f32.mrf.mxu1  ;;  %v957_v63 = vmul.f32 %v1720_v33, %v1720_v33 }
  0xfd   :  { %752 = vst.msk [vmem:[%s2255_s2 + $0xd0] sm:$0xff] %vm725_vm2, %v536_v4  ;;  %v841_v9 = vsel %vm725_vm2, %v536_v4, 0.0  ;;  %v951_v12 = vmul.f32 %v536_v4, %v536_v4  ;;  %781 = vst.msk [vmem:[%s2255_s2 + $0x1b8] sm:$0xff] %vm725_vm2, %v1993_v13  ;;  %v1042_v26 = vsel %vm725_vm2, %v952_v8, 0.0  ;;  %v853_v8 = vsel %vm725_vm2, %v1720_v33, 0.0 }
  0xfe   :  { %v842_v14 = vadd.f32 %v841_v9, %v840_v6  ;;  %v1039_v15 = vadd.f32 %v1038_v7, %v1037_v2  ;;  %v1317_v16 = vpop.f32.mrf.mxu0  ;;  %v2006_v21 = vpop.f32.mrf.mxu1  ;;  %v958_v7 = vmul.f32 %v1707_v27, %v1707_v27 }
  0xff   :  { %v1040_v18 = vsel %vm725_vm2, %v951_v12, 0.0  ;;  %755 = vst.msk [vmem:[%s2255_s2 + $0xe8] sm:$0xff] %vm725_vm2, %v1317_v16  ;;  %780 = vst.msk [vmem:[%s2255_s2 + $0x1b0] sm:$0xff] %vm725_vm2, %v2006_v21  ;;  %v954_v29 = vmul.f32 %v1317_v16, %v1317_v16  ;;  %v847_v39 = vsel %vm725_vm2, %v1317_v16, 0.0  ;;  %v1052_v16 = vsel %vm725_vm2, %v957_v63, 0.0 }
 0x100   :  { %v1041_v22 = vadd.f32 %v1040_v18, %v1039_v15  ;;  %v546_v23 = vpop.f32.mrf.mxu0  ;;  %v844_v24 = vadd.f32 %v843_v17, %v842_v14  ;;  %v2019_v32 = vpop.f32.mrf.mxu1  ;;  %v855_v15 = vsel %vm725_vm2, %v1707_v27, 0.0  ;;  %v959_v17 = vmul.f32 %v1746_v47, %v1746_v47 }
 0x101   :  { %754 = vst.msk [vmem:[%s2255_s2 + $0xe0] sm:$0xff] %vm725_vm2, %v546_v23  ;;  %v845_v30 = vsel %vm725_vm2, %v546_v23, 0.0  ;;  %v953_v31 = vmul.f32 %v546_v23, %v546_v23  ;;  %783 = vst.msk [vmem:[%s2255_s2 + $0x1c8] sm:$0xff] %vm725_vm2, %v2019_v32  ;;  %v1046_v49 = vsel %vm725_vm2, %v954_v29, 0.0  ;;  %v1054_v23 = vsel %vm725_vm2, %v958_v7, 0.0 }
 0x102   :  { %v846_v34 = vadd.f32 %v845_v30, %v844_v24  ;;  %v1043_v36 = vadd.f32 %v1042_v26, %v1041_v22  ;;  %v1320_v37 = vpop.f32.mrf.mxu0  ;;  %v2032_v43 = vpop.f32.mrf.mxu1  ;;  %v960_v27 = vmul.f32 %v1733_v41, %v1733_v41  ;;  %v857_v24 = vsel %vm725_vm2, %v1746_v47, 0.0 }
 0x103   :  { %v1044_v40 = vsel %vm725_vm2, %v953_v31, 0.0  ;;  %757 = vst.msk [vmem:[%s2255_s2 + $0xf8] sm:$0xff] %vm725_vm2, %v1320_v37  ;;  %782 = vst.msk [vmem:[%s2255_s2 + $0x1c0] sm:$0xff] %vm725_vm2, %v2032_v43  ;;  %v956_v50 = vmul.f32 %v1320_v37, %v1320_v37  ;;  %v851_v60 = vsel %vm725_vm2, %v1320_v37, 0.0  ;;  %v859_v31 = vsel %vm725_vm2, %v1733_v41, 0.0 }
 0x104   :  { %v1045_v44 = vadd.f32 %v1044_v40, %v1043_v36  ;;  %v556_v45 = vpop.f32.mrf.mxu0  ;;  %v848_v48 = vadd.f32 %v847_v39, %v846_v34  ;;  %v2045_v54 = vpop.f32.mrf.mxu1  ;;  %v1056_v34 = vsel %vm725_vm2, %v959_v17, 0.0  ;;  %v961_v36 = vmul.f32 %v1772_v61, %v1772_v61 }
 0x105   :  { %756 = vst.msk [vmem:[%s2255_s2 + $0xf0] sm:$0xff] %vm725_vm2, %v556_v45  ;;  %v849_v52 = vsel %vm725_vm2, %v556_v45, 0.0  ;;  %v955_v53 = vmul.f32 %v556_v45, %v556_v45  ;;  %785 = vst.msk [vmem:[%s2255_s2 + $0x1d8] sm:$0xff] %vm725_vm2, %v2045_v54  ;;  %v1050_v6 = vsel %vm725_vm2, %v956_v50, 0.0  ;;  %v1058_v40 = vsel %vm725_vm2, %v960_v27, 0.0 }
 0x106   :  { %v850_v56 = vadd.f32 %v849_v52, %v848_v48  ;;  %v1047_v59 = vadd.f32 %v1046_v49, %v1045_v44  ;;  %v2056_v0 = vpop.f32.mrf.mxu1  ;;  %v962_v41 = vmul.f32 %v1759_v55, %v1759_v55  ;;  %v861_v44 = vsel %vm725_vm2, %v1772_v61, 0.0 }
 0x107   :  { %v1048_v62 = vsel %vm725_vm2, %v955_v53, 0.0  ;;  %784 = vst.msk [vmem:[%s2255_s2 + $0x1d0] sm:$0xff] %vm725_vm2, %v2056_v0  ;;  %v863_v49 = vsel %vm725_vm2, %v1759_v55, 0.0  ;;  %v1060_v50 = vsel %vm725_vm2, %v961_v36, 0.0  ;;  %v963_v52 = vmul.f32 %v1798_v11, %v1798_v11 }
 0x108   :  { %v852_v2 = vadd.f32 %v851_v60, %v850_v56  ;;  %v1049_v4 = vadd.f32 %v1048_v62, %v1047_v59  ;;  %v2068_v9 = vpop.f32.mrf.mxu1  ;;  %v1062_v59 = vsel %vm725_vm2, %v962_v41, 0.0  ;;  %v964_v60 = vmul.f32 %v1785_v5, %v1785_v5 }
 0x109   :  { %787 = vst.msk [vmem:[%s2255_s2 + $0x1e8] sm:$0xff] %vm725_vm2, %v2068_v9  ;;  %v865_v61 = vsel %vm725_vm2, %v1798_v11, 0.0  ;;  %v867_v55 = vsel %vm725_vm2, %v1785_v5, 0.0  ;;  %v869_v11 = vsel %vm725_vm2, %v1824_v25, 0.0  ;;  %v871_v5 = vsel %vm725_vm2, %v1811_v19, 0.0 }
 0x10a   :  { %v1051_v12 = vadd.f32 %v1050_v6, %v1049_v4  ;;  %v854_v14 = vadd.f32 %v853_v8, %v852_v2  ;;  %v2080_v18 = vpop.f32.mrf.mxu1  ;;  %v1064_v2 = vsel %vm725_vm2, %v963_v52, 0.0  ;;  %v965_v4 = vmul.f32 %v1824_v25, %v1824_v25 }
 0x10b   :  { %786 = vst.msk [vmem:[%s2255_s2 + $0x1e0] sm:$0xff] %vm725_vm2, %v2080_v18  ;;  %v1066_v8 = vsel %vm725_vm2, %v964_v60, 0.0  ;;  %v967_v17 = vmul.f32 %v1850_v42, %v1850_v42  ;;  %v968_v27 = vmul.f32 %v1837_v35, %v1837_v35  ;;  %v873_v25 = vsel %vm725_vm2, %v1850_v42, 0.0 }
 0x10c   :  { %v1053_v33 = vadd.f32 %v1052_v16, %v1051_v12  ;;  %v856_v22 = vadd.f32 %v855_v15, %v854_v14  ;;  %v2092_v26 = vpop.f32.mrf.mxu1  ;;  %v966_v12 = vmul.f32 %v1811_v19, %v1811_v19  ;;  %v1068_v16 = vsel %vm725_vm2, %v965_v4, 0.0 }
 0x10d   :  { %789 = vst.msk [vmem:[%s2255_s2 + $0x1f8] sm:$0xff] %vm725_vm2, %v2092_v26  ;;  %v875_v19 = vsel %vm725_vm2, %v1837_v35, 0.0  ;;  %v877_v42 = vsel %vm725_vm2, %v1876_v58, 0.0  ;;  %v879_v35 = vsel %vm725_vm2, %v1863_v51, 0.0  ;;  %v972_v52 = vmul.f32 %v1889_v3, %v1889_v3 }
 0x10e   :  { %v858_v29 = vadd.f32 %v857_v24, %v856_v22  ;;  %v1055_v30 = vadd.f32 %v1054_v23, %v1053_v33  ;;  %v2104_v37 = vpop.f32.mrf.mxu1  ;;  %v1070_v23 = vsel %vm725_vm2, %v966_v12, 0.0  ;;  %v973_v60 = vmul.f32 %v1928_v28, %v1928_v28 }
 0x10f   :  { %788 = vst.msk [vmem:[%s2255_s2 + $0x1f0] sm:$0xff] %vm725_vm2, %v2104_v37  ;;  %s1394_s2 = smov [#allocation2]  }
 0x110   :  { %v1057_v47 = vadd.f32 %v1056_v34, %v1055_v30  ;;  %v860_v39 = vadd.f32 %v859_v31, %v858_v29  ;;  %v1072_v30 = vsel %vm725_vm2, %v967_v17, 0.0  ;;  %v969_v31 = vmul.f32 %v1876_v58, %v1876_v58  ;;  %s1131_s13 = sshll.u32 %s1394_s2, 4  ;;  %s1132_s13 = int_to_ptr.vmem [resolvable:$true] %s1131_s13 }
 0x111   :  { %v881_v58 = vsel %vm725_vm2, %v1902_v10, 0.0  ;;  %v977_v17 = vmul.f32 %v1980_v1, %v1980_v1  ;;  %s1372_s14 = scalar_lea.vmem %s1132_s13, 32  ;;  %p1377_p1 = scmp.lt.s32.totalorder %s1132_s13, %s1132_s13 }
 0x112   :  { %v862_v45 = vadd.f32 %v861_v44, %v860_v39  ;;  %v1059_v48 = vadd.f32 %v1058_v40, %v1057_v47  ;;  %v1074_v47 = vsel %vm725_vm2, %v968_v27, 0.0  ;;  %v970_v39 = vmul.f32 %v1863_v51, %v1863_v51  ;;  %p1373_p0 = scmp.ne.s32.totalorder %s1132_s13, %s1372_s14  ;;  %p1378_p2 = scmp.lt.s32.totalorder %s1372_s14, %s1372_s14 }
 0x113   :  { %v1076_v44 = vsel %vm725_vm2, %v969_v31, 0.0  ;;  %v883_v51 = vsel %vm725_vm2, %v1889_v3, 0.0  ;;  %v887_v3 = vsel %vm725_vm2, %v1915_v20, 0.0  ;;  %v978_v27 = vmul.f32 %v1967_v57, %v1967_v57 }
 0x114   :  { %v1061_v53 = vadd.f32 %v1060_v50, %v1059_v48  ;;  %v864_v56 = vadd.f32 %v863_v49, %v862_v45  ;;  %v971_v45 = vmul.f32 %v1902_v10, %v1902_v10  ;;  %v1078_v50 = vsel %vm725_vm2, %v970_v39, 0.0  ;;  %p1379_p3 = por %p1378_p2, %p1377_p1 }
 0x115   :  { %v885_v10 = vsel %vm725_vm2, %v1928_v28, 0.0  ;;  %v889_v28 = vsel %vm725_vm2, %v1954_v46, 0.0 }
 0x116   :  { %v866_v62 = vadd.f32 %v865_v61, %v864_v56  ;;  %v1063_v63 = vadd.f32 %v1062_v59, %v1061_v53  ;;  %v1080_v59 = vsel %vm725_vm2, %v971_v45, 0.0  ;;  %v982_v45 = vmul.f32 %v2019_v32, %v2019_v32  ;;  %p1380_p4 = pnand %p1379_p3, %p1373_p0 }
 0x118   :  { %v1065_v6 = vadd.f32 %v1064_v2, %v1063_v63  ;;  %v868_v7 = vadd.f32 %v867_v55, %v866_v62  ;;  %v1082_v63 = vsel %vm725_vm2, %v972_v52, 0.0  ;;  %v974_v55 = vmul.f32 %v1915_v20, %v1915_v20 }
 0x119   :  { %v891_v20 = vsel %vm725_vm2, %v1941_v38, 0.0  ;;  %v983_v52 = vmul.f32 %v2056_v0, %v2056_v0 }
 0x11a   :  { %v870_v14 = vadd.f32 %v869_v11, %v868_v7  ;;  %v1067_v15 = vadd.f32 %v1066_v8, %v1065_v6  ;;  %v1084_v6 = vsel %vm725_vm2, %v973_v60, 0.0  ;;  %v975_v7 = vmul.f32 %v1954_v46, %v1954_v46 }
 0x11b   :  { %v1086_v11 = vsel %vm725_vm2, %v974_v55, 0.0  ;;  %v893_v46 = vsel %vm725_vm2, %v1980_v1, 0.0  ;;  %v897_v1 = vsel %vm725_vm2, %v2006_v21, 0.0 }
 0x11c   :  { %v1069_v33 = vadd.f32 %v1068_v16, %v1067_v15  ;;  %v872_v22 = vadd.f32 %v871_v5, %v870_v14  ;;  %v976_v14 = vmul.f32 %v1941_v38, %v1941_v38  ;;  %v1088_v16 = vsel %vm725_vm2, %v975_v7, 0.0 }
 0x11d   :  { %v895_v38 = vsel %vm725_vm2, %v1967_v57, 0.0  ;;  %v899_v57 = vsel %vm725_vm2, %v1993_v13, 0.0  ;;  %v987_v7 = vmul.f32 %v2104_v37, %v2104_v37 }
 0x11e   :  { %v874_v24 = vadd.f32 %v873_v25, %v872_v22  ;;  %v1071_v29 = vadd.f32 %v1070_v23, %v1069_v33  ;;  %v1090_v23 = vsel %vm725_vm2, %v976_v14, 0.0  ;;  %v988_v14 = vmul.f32 %v2092_v26, %v2092_v26 }
 0x120   :  { %v1073_v34 = vadd.f32 %v1072_v30, %v1071_v29  ;;  %v876_v36 = vadd.f32 %v875_v19, %v874_v24  ;;  %v1092_v29 = vsel %vm725_vm2, %v977_v17, 0.0  ;;  %v979_v19 = vmul.f32 %v2006_v21, %v2006_v21 }
 0x121   :  { %v901_v21 = vsel %vm725_vm2, %v2032_v43, 0.0  ;;  %v1114_v17 = vsel %vm725_vm2, %v988_v14, 0.0 }
 0x122   :  { %v878_v40 = vadd.f32 %v877_v42, %v876_v36  ;;  %v1075_v41 = vadd.f32 %v1074_v47, %v1073_v34  ;;  %v1094_v34 = vsel %vm725_vm2, %v978_v27, 0.0  ;;  %v980_v36 = vmul.f32 %v1993_v13, %v1993_v13 }
 0x123   :  { %v1096_v42 = vsel %vm725_vm2, %v979_v19, 0.0  ;;  %v903_v13 = vsel %vm725_vm2, %v2019_v32, 0.0  ;;  %v907_v32 = vsel %vm725_vm2, %v2045_v54, 0.0 }
 0x124   :  { %v1077_v48 = vadd.f32 %v1076_v44, %v1075_v41  ;;  %v880_v49 = vadd.f32 %v879_v35, %v878_v40  ;;  %v981_v40 = vmul.f32 %v2032_v43, %v2032_v43  ;;  %v1098_v44 = vsel %vm725_vm2, %v980_v36, 0.0 }
 0x125   :  { %v905_v43 = vsel %vm725_vm2, %v2056_v0, 0.0  ;;  %v909_v0 = vsel %vm725_vm2, %v2080_v18, 0.0 }
 0x126   :  { %v882_v53 = vadd.f32 %v881_v58, %v880_v49  ;;  %v1079_v56 = vadd.f32 %v1078_v50, %v1077_v48  ;;  %v1100_v50 = vsel %vm725_vm2, %v981_v40, 0.0 }
 0x128   :  { %v1081_v61 = vadd.f32 %v1080_v59, %v1079_v56  ;;  %v884_v62 = vadd.f32 %v883_v51, %v882_v53  ;;  %v1102_v56 = vsel %vm725_vm2, %v982_v45, 0.0  ;;  %v984_v51 = vmul.f32 %v2045_v54, %v2045_v54 }
 0x129   :  { %v911_v54 = vsel %vm725_vm2, %v2068_v9, 0.0 }
 0x12a   :  { %v886_v2 = vadd.f32 %v885_v10, %v884_v62  ;;  %v1083_v4 = vadd.f32 %v1082_v63, %v1081_v61  ;;  %v1104_v61 = vsel %vm725_vm2, %v983_v52, 0.0  ;;  %v985_v62 = vmul.f32 %v2080_v18, %v2080_v18 }
 0x12b   :  { %v1106_v10 = vsel %vm725_vm2, %v984_v51, 0.0  ;;  %v913_v18 = vsel %vm725_vm2, %v2104_v37, 0.0 }
 0x12c   :  { %v1085_v8 = vadd.f32 %v1084_v6, %v1083_v4  ;;  %v888_v12 = vadd.f32 %v887_v3, %v886_v2  ;;  %v986_v2 = vmul.f32 %v2068_v9, %v2068_v9  ;;  %v1108_v6 = vsel %vm725_vm2, %v985_v62, 0.0 }
 0x12d   :  { %v915_v9 = vsel %vm725_vm2, %v2092_v26, 0.0 }
 0x12e   :  { %v890_v15 = vadd.f32 %v889_v28, %v888_v12  ;;  %v1087_v5 = vadd.f32 %v1086_v11, %v1085_v8  ;;  %v1110_v11 = vsel %vm725_vm2, %v986_v2, 0.0 }
 0x130   :  { %v1089_v33 = vadd.f32 %v1088_v16, %v1087_v5  ;;  %v892_v22 = vadd.f32 %v891_v20, %v890_v15  ;;  %v1112_v5 = vsel %vm725_vm2, %v987_v7, 0.0 }
 0x132   :  { %v894_v25 = vadd.f32 %v893_v46, %v892_v22  ;;  %v1091_v24 = vadd.f32 %v1090_v23, %v1089_v33 }
 0x134   :  { %v1093_v30 = vadd.f32 %v1092_v29, %v1091_v24  ;;  %v896_v31 = vadd.f32 %v895_v38, %v894_v25 }
 0x136   :  { %v898_v47 = vadd.f32 %v897_v1, %v896_v31  ;;  %v1095_v39 = vadd.f32 %v1094_v34, %v1093_v30 }
 0x138   :  { %v1097_v41 = vadd.f32 %v1096_v42, %v1095_v39  ;;  %v900_v35 = vadd.f32 %v899_v57, %v898_v47 }
 0x13a   :  { %v902_v48 = vadd.f32 %v901_v21, %v900_v35  ;;  %v1099_v49 = vadd.f32 %v1098_v44, %v1097_v41 }
 0x13c   :  { %v1101_v58 = vadd.f32 %v1100_v50, %v1099_v49  ;;  %v904_v53 = vadd.f32 %v903_v13, %v902_v48 }
 0x13e   :  { %v906_v59 = vadd.f32 %v905_v43, %v904_v53  ;;  %v1103_v60 = vadd.f32 %v1102_v56, %v1101_v58 }
 0x140   :  { %v1105_v63 = vadd.f32 %v1104_v61, %v1103_v60  ;;  %v908_v55 = vadd.f32 %v907_v32, %v906_v59 }
 0x142   :  { %v910_v4 = vadd.f32 %v909_v0, %v908_v55  ;;  %v1107_v3 = vadd.f32 %v1106_v10, %v1105_v63 }
 0x144   :  { %v1109_v8 = vadd.f32 %v1108_v6, %v1107_v3  ;;  %v912_v12 = vadd.f32 %v911_v54, %v910_v4 }
 0x146   :  { %v914_v28 = vadd.f32 %v913_v18, %v912_v12  ;;  %v1111_v15 = vadd.f32 %v1110_v11, %v1109_v8 }
 0x148   :  { %v916_v20 = vadd.f32 %v915_v9, %v914_v28  ;;  %v1113_v16 = vadd.f32 %v1112_v5, %v1111_v15 }
 0x14a   :  { %v917_v33 = vrot.slane %v916_v20, 4  ;;  %v1115_v22 = vadd.f32 %v1114_v17, %v1113_v16 }
 0x14c   :  { %v918_v23 = vadd.f32 %v917_v33, %v916_v20  ;;  %v1116_v27 = vrot.slane %v1115_v22, 4 }
 0x14e   :  { %v919_v46 = vrot.slane %v918_v23, 2  ;;  %v1117_v25 = vadd.f32 %v1116_v27, %v1115_v22 }
 0x150   :  { %v920_v24 = vadd.f32 %v919_v46, %v918_v23  ;;  %v1118_v38 = vrot.slane %v1117_v25, 2 }
 0x152   :  { %v921_v37 = vrot.slane %v920_v24, 1  ;;  %v1119_v29 = vadd.f32 %v1118_v38, %v1117_v25 }
 0x154   :  { %v922_v26 = vadd.f32 %v921_v37, %v920_v24  ;;  %v1120_v19 = vrot.slane %v1119_v29, 1 }
 0x156   :  { %924 = vst.msk [vmem:[#allocation2] sm:$0x1] %vm923_vm3, %v922_v26  ;;  %v1121_v30 = vadd.f32 %v1120_v19, %v1119_v29 }
 0x158   :  { %1122 = vst.msk [vmem:[#allocation2 + $0x1] sm:$0x1] %vm923_vm3, %v1121_v30 }
 0x159   :  { %1383 = shalt.err (!%p1380_p4)
}
 0x15a   :  { %1134 = dma.vmem_to_hbm [thread:$0]  %s1132_s13, 32, %s2256_s3, [#allocation3]  }
 0x15b   :  { %1392 = dma.done.wait [#allocation3], 32  }
 0x15c   :  { %1393 = vsyncadd [#allocation3], 4294967264 }
 0x15d   :  { %1140 = vsyncpa [#allocation3], 1 }

</bundles_post_ra>
